<compile_context>
chip_gen: v5e
topology: v5e:2x2
jax: 0.10.0
libtpu: 0.0.40
codegen_flags: <defaults>
</compile_context>

<pallas_src>
import functools

import numpy as np
import jax
import jax.numpy as jnp
from jax.experimental import pallas as pl
from jax.experimental.pallas import tpu as pltpu


# ----------------------------- helpers ---------------------------------------

def _round_up(x: int, m: int) -> int:
    return (x + m - 1) // m * m


def _choose_node_tile(n: int) -> int:
    # Largest 128-multiple tile (capped at 512) that still leaves ni >= 2 row tiles.
    # Bigger tiles amortize the ~0.35us per-grid-step overhead and issue larger
    # contiguous DMAs (~85% of HBM roofline at 512 vs ~63% at 256); ni >= 2 keeps
    # both v7x TensorCores fed via the 'parallel' row axis.
    for t in (512, 256, 128):
        if n > t:
            return t
    return 128


def gcn_norm_dense(edge_index, num_nodes):
    """Dense equivalent of PyG gcn_norm (self loops + symmetric norm). Reference only."""
    src = edge_index[0]
    dst = edge_index[1]
    loop = jnp.arange(num_nodes, dtype=edge_index.dtype)
    src = jnp.concatenate([src, loop])
    dst = jnp.concatenate([dst, loop])
    a = jnp.zeros((num_nodes, num_nodes), dtype=jnp.float32).at[dst, src].add(1.0)
    deg = a.sum(axis=1)
    dinv = jnp.where(deg > 0, 1.0 / jnp.sqrt(deg), 0.0)
    return dinv[:, None] * a * dinv[None, :]


# ----------------------------- Pallas kernel ---------------------------------

def _gcn_layer_kernel(nz_ref, nnz_ref, a_ref, x_ref, dinv_ref, wt_ref, b_ref,
                      o_ref, acc_ref, *, t_node, max_nnz):
    i = pl.program_id(0)   # output row tile
    j = pl.program_id(1)   # position in this row tile's compacted nonzero-tile list

    @pl.when(j == 0)
    def _():
        acc_ref[...] = jnp.zeros_like(acc_ref)

    # Only the first nnz[i] steps carry fresh A tiles; trailing steps repeat the
    # last block index (no DMA) and must be skipped to avoid double counting.
    @pl.when(j < nnz_ref[i])
    def _():
        kt = nz_ref[i * max_nnz + j]                       # source-node tile index
        src0 = pl.multiple_of(kt * t_node, t_node)
        xs = x_ref[pl.ds(src0, t_node), :]                 # resident x, sliced in VMEM
        # int8 tile (exact small counts) -> bf16 for the MXU; cast via f32 on the
        # VPU, free under the exposed DMA slack of a mem-bound kernel.
        a = a_ref[...].astype(jnp.float32).astype(jnp.bfloat16)
        acc_ref[...] += jnp.dot(a, xs, preferred_element_type=jnp.float32)

    # Finalize once per row tile: row-side D^{-1/2}, weight matmul, bias, ReLU.
    @pl.when(j == nnz_ref[i] - 1)
    def _():
        h = acc_ref[...] * dinv_ref[...]                   # (t, d) * (t, 1), f32
        # bf16 cast keeps the MXU in fast bf16 mode (documented precision trade-off).
        h = jnp.dot(h.astype(jnp.bfloat16), wt_ref[...],
                    preferred_element_type=jnp.float32)
        h = jnp.maximum(h + b_ref[...], 0.0)
        o_ref[...] = h.astype(o_ref.dtype)


def _gcn_layer(nz_idx, nnz, a_i8, xs, dinv, wt, b):
    """One GCN layer + ReLU on padded inputs. Returns padded bf16 activations."""
    n_pad = a_i8.shape[0]
    ni = nnz.shape[0]
    max_nnz = nz_idx.shape[0] // ni
    t_node = n_pad // ni
    d_pad = wt.shape[0]

    # Advisory cost estimate (upper bound: treats every listed tile as real work).
    flops = 2 * ni * max_nnz * t_node * t_node * d_pad + 2 * n_pad * d_pad * d_pad
    bytes_accessed = (
        ni * max_nnz * t_node * t_node      # A tiles actually streamed (int8, 1 B)
        + n_pad * d_pad * 2                 # resident x (fetched once)
        + d_pad * d_pad * 2 + d_pad * 4     # W^T + bias
        + n_pad * 4                         # dinv
        + n_pad * d_pad * 2                 # output
    )

    # Explicit VMEM budget (default double-buffering accounted), capped at 48 MiB
    # so the same layout fits v7x's 64 MiB VMEM with headroom.
    vmem_bytes = (
        2 * t_node * t_node                 # A tile (int8), 2 buffers
        + 2 * n_pad * d_pad * 2             # resident x (bf16), 2 buffers
        + 2 * d_pad * d_pad * 2             # resident W^T (bf16), 2 buffers
        + 2 * t_node * 128 * 4              # dinv tile (lane-padded), 2 buffers
        + 2 * 8 * d_pad * 4                 # bias (sublane-padded), 2 buffers
        + 2 * t_node * d_pad * 2            # output, 2 buffers
        + t_node * d_pad * 4                # f32 accumulator scratch
    )
    vmem_limit = int(min(48 * 1024 * 1024, max(16 * 1024 * 1024, 2 * vmem_bytes)))

    grid_spec = pltpu.PrefetchScalarGridSpec(
        num_scalar_prefetch=2,              # nz_idx (flat) and nnz live in SMEM
        grid=(ni, max_nnz),
        in_specs=[
            # A tile: data-dependent column-tile index -> all-zero tiles never DMA.
            pl.BlockSpec((t_node, t_node),
                         lambda i, j, nz, nnz: (i, nz[i * max_nnz + j])),
            # x fully resident in VMEM: constant block index -> fetched exactly once.
            pl.BlockSpec((n_pad, d_pad), lambda i, j, nz, nnz: (0, 0)),
            # per-row-tile D^{-1/2} column vector.
            pl.BlockSpec((t_node, 1), lambda i, j, nz, nnz: (i, 0)),
            # resident, pre-transposed weights and bias.
            pl.BlockSpec((d_pad, d_pad), lambda i, j, nz, nnz: (0, 0)),
            pl.BlockSpec((1, d_pad), lambda i, j, nz, nnz: (0, 0)),
        ],
        out_specs=pl.BlockSpec((t_node, d_pad), lambda i, j, nz, nnz: (i, 0)),
        scratch_shapes=[pltpu.VMEM((t_node, d_pad), jnp.float32)],
    )

    return pl.pallas_call(
        functools.partial(_gcn_layer_kernel, t_node=t_node, max_nnz=max_nnz),
        out_shape=jax.ShapeDtypeStruct((n_pad, d_pad), jnp.bfloat16),
        grid_spec=grid_spec,
        compiler_params=pltpu.CompilerParams(
            dimension_semantics=("parallel", "arbitrary"),
            vmem_limit_bytes=vmem_limit,
        ),
        cost_estimate=pl.CostEstimate(
            flops=flops, transcendentals=0, bytes_accessed=bytes_accessed
        ),
    )(nz_idx, nnz, a_i8, xs, dinv, wt, b)


# ------------------------------ JAX glue --------------------------------------

@jax.jit
def gnn_forward(x, a_i8, dinv, nz_idx, nnz, wt_stack, b_stack):
    """All layers under one jit; the graph arrays are prebuilt/cached per graph."""
    n, d = x.shape
    n_pad = a_i8.shape[0]
    num_layers, d_pad, _ = wt_stack.shape

    # Lane-dense, zero-padded activations. Padded rows/cols stay harmless because
    # dinv is 0 for padded nodes: the per-layer source-side scaling zeroes them
    # even if a bias were nonzero.
    h = jnp.zeros((n_pad, d_pad), jnp.float32).at[:n, :d].set(x)
    for l in range(num_layers):
        xs = (h * dinv).astype(jnp.bfloat16)   # source-side D^{-1/2}, once per layer
        h = _gcn_layer(nz_idx, nnz, a_i8, xs, dinv, wt_stack[l], b_stack[l])
    return h[:n, :d].astype(jnp.float32)


def _prepare_graph(edge_index, num_nodes):
    """Once per graph (host): padded int8 (A+I), D^{-1/2}, and per-row-tile
    compacted nonzero column-tile index lists for the data-dependent DMA skip."""
    t_node = _choose_node_tile(num_nodes)
    n_pad = _round_up(num_nodes, t_node)
    ni = n_pad // t_node

    ei = np.asarray(jax.device_get(edge_index)).astype(np.int64)
    src, dst = ei[0], ei[1]
    idx = np.arange(num_nodes)

    deg = np.zeros(num_nodes, np.float64)
    np.add.at(deg, dst, 1.0)
    deg += 1.0                                   # self loop
    dinv = np.zeros((n_pad, 1), np.float32)
    dinv[:num_nodes, 0] = 1.0 / np.sqrt(deg)

    a = np.zeros((n_pad, n_pad), np.int8)        # small integer counts: exact in bf16
    np.add.at(a, (dst, src), 1)
    a[idx, idx] += 1                             # self loops

    mask = np.zeros((ni, ni), bool)
    mask[dst // t_node, src // t_node] = True
    mask[idx // t_node, idx // t_node] = True
    nz_lists = []
    for i in range(ni):
        ks = np.nonzero(mask[i])[0].astype(np.int32)
        if ks.size == 0:                         # fully-padded row tile: one dummy
            ks = np.array([i], np.int32)
        nz_lists.append(ks)
    max_nnz = max(len(ks) for ks in nz_lists)
    nz_idx = np.zeros((ni, max_nnz), np.int32)
    nnz = np.zeros((ni,), np.int32)
    for i, ks in enumerate(nz_lists):
        nnz[i] = len(ks)
        nz_idx[i, : len(ks)] = ks
        nz_idx[i, len(ks):] = ks[-1]             # repeat last index -> no re-DMA
    return (jnp.asarray(a), jnp.asarray(dinv),
            jnp.asarray(nz_idx.reshape(-1)), jnp.asarray(nnz))


class GNN:
    """JAX/Pallas port of the torch module: stack of GCNConv(d, d) + ReLU."""

    def __init__(self, embedding_dim: int, num_layers: int, key):
        self.embedding_dim = embedding_dim
        self.num_layers = num_layers
        d_pad = _round_up(embedding_dim, 128)

        limit = (6.0 / (embedding_dim + embedding_dim)) ** 0.5  # glorot (PyG default)
        self.weights, self.biases = [], []
        for _ in range(num_layers):
            key, wk = jax.random.split(key)
            w = jax.random.uniform(
                wk, (embedding_dim, embedding_dim), jnp.float32, -limit, limit
            )  # (out, in), like torch.nn.Linear
            b = jnp.zeros((embedding_dim,), jnp.float32)  # GCNConv bias init = zeros
            self.weights.append(w)
            self.biases.append(b)

        # Pre-transposed, zero-padded parameter stacks (bf16 weights, f32 bias).
        wt_pad = jnp.zeros((num_layers, d_pad, d_pad), jnp.float32)
        b_pad = jnp.zeros((num_layers, 1, d_pad), jnp.float32)
        for l in range(num_layers):
            wt_pad = wt_pad.at[l, :embedding_dim, :embedding_dim].set(self.weights[l].T)
            b_pad = b_pad.at[l, 0, :embedding_dim].set(self.biases[l])
        self.wt_stack = wt_pad.astype(jnp.bfloat16)
        self.b_stack = b_pad
        self._graph_cache = {}

    def _graph(self, edge_index, num_nodes):
        key = (int(num_nodes), np.asarray(jax.device_get(edge_index)).tobytes())
        if key not in self._graph_cache:
            self._graph_cache[key] = _prepare_graph(edge_index, num_nodes)
        return self._graph_cache[key]

    def __call__(self, x, edge_index):
        a_i8, dinv, nz_idx, nnz = self._graph(edge_index, x.shape[0])
        return gnn_forward(x, a_i8, dinv, nz_idx, nnz, self.wt_stack, self.b_stack)


def _reference(x, edge_index, weights, biases):
    """Pure-JAX f32 reference with the original GCNConv ordering."""
    a_hat = gcn_norm_dense(edge_index, x.shape[0])
    h = x
    for w, b in zip(weights, biases):
        h = jnp.maximum(a_hat @ (h @ w.T) + b[None, :], 0.0)
    return h


# ------------------------------- main -----------------------------------------

if __name__ == "__main__":
    key = jax.random.PRNGKey(0)
    num_layers = 2

    # --- test 1: small graph (single tile) -----------------------------------
    num_nodes, embedding_dim = 8, 32
    src = jnp.arange(num_nodes, dtype=jnp.int32)
    dst = (src + 1) % num_nodes
    edge_index = jnp.stack(
        [jnp.concatenate([src, dst]), jnp.concatenate([dst, src])], axis=0
    )
    key, xk, mk = jax.random.split(key, 3)
    x = jax.random.normal(xk, (num_nodes, embedding_dim), jnp.float32)

    model = GNN(embedding_dim, num_layers, mk)
    out = jax.block_until_ready(model(x, edge_index))
    out_again = jax.block_until_ready(model(x, edge_index))   # exercises the graph cache
    ref = _reference(x, edge_index, model.weights, model.biases)
    assert out.shape == ref.shape
    assert jnp.allclose(out, out_again)
    assert jnp.allclose(out, ref, atol=5e-2, rtol=5e-2), (
        f"mismatch (small): max err {jnp.max(jnp.abs(out - ref))}"
    )

    # --- test 2: larger graph (multi-tile grid, exercises the DMA skip) -------
    n2, d2 = 300, 64
    ring_n = 200  # ring over nodes 0..199; nodes 200..299 only get self loops
    src2 = jnp.arange(ring_n, dtype=jnp.int32)
    dst2 = (src2 + 1) % ring_n
    edge_index2 = jnp.stack(
        [jnp.concatenate([src2, dst2]), jnp.concatenate([dst2, src2])], axis=0
    )
    key, xk2, mk2 = jax.random.split(key, 3)
    x2 = jax.random.normal(xk2, (n2, d2), jnp.float32)

    model2 = GNN(d2, num_layers, mk2)
    out2 = jax.block_until_ready(model2(x2, edge_index2))
    ref2 = _reference(x2, edge_index2, model2.weights, model2.biases)
    assert jnp.allclose(out2, ref2, atol=5e-2, rtol=5e-2), (
        f"mismatch (large): max err {jnp.max(jnp.abs(out2 - ref2))}"
    )

    print("KERNEL_OK")
</pallas_src>

<mosaic_0001>
module attributes {stable_mosaic.version = 11 : i64} {
  func.func @_gcn_layer_kernel(%arg0: i32, %arg1: i32, %arg2: memref<1xi32, #tpu.memory_space<smem>>, %arg3: memref<1xi32, #tpu.memory_space<smem>>, %arg4: memref<128x128xi8, #tpu.memory_space<vmem>>, %arg5: memref<128x128xbf16, #tpu.memory_space<vmem>>, %arg6: memref<128x1xf32, #tpu.memory_space<vmem>>, %arg7: memref<128x128xbf16, #tpu.memory_space<vmem>>, %arg8: memref<1x128xf32, #tpu.memory_space<vmem>>, %arg9: memref<128x128xbf16, #tpu.memory_space<vmem>>, %arg10: memref<128x128xf32, #tpu.memory_space<vmem>>) attributes {dimension_semantics = [#tpu.dimension_semantics<parallel>, #tpu.dimension_semantics<arbitrary>], iteration_bounds = array<i64: 1, 1>, scalar_prefetch = 2 : i64, scratch_operands = 1 : i64, tpu.core_type = #tpu.core_type<tc>, window_params = [{transform_indices = @transform_0, window_bounds = array<i64: 128, 128>}, {pipeline_mode = #tpu.pipeline_mode<synchronous>, transform_indices = @transform_1, window_bounds = array<i64: 128, 128>}, {transform_indices = @transform_2, window_bounds = array<i64: 128, 1>}, {pipeline_mode = #tpu.pipeline_mode<synchronous>, transform_indices = @transform_3, window_bounds = array<i64: 128, 128>}, {pipeline_mode = #tpu.pipeline_mode<synchronous>, transform_indices = @transform_4, window_bounds = array<i64: 1, 128>}, {transform_indices = @transform_5, window_bounds = array<i64: 128, 128>}]} {
    %c0_i32 = arith.constant 0 : i32
    %0 = arith.cmpi eq, %arg1, %c0_i32 : i32
    %1 = arith.extui %0 : i1 to i32
    %c0_i32_0 = arith.constant 0 : i32
    %2 = arith.cmpi ne, %1, %c0_i32_0 : i32
    scf.if %2 {
      %cst = arith.constant 0.000000e+00 : f32
      %14 = vector.broadcast %cst : f32 to vector<128x128xf32>
      %c0 = arith.constant 0 : index
      %c0_3 = arith.constant 0 : index
      %15 = vector.load %arg10[%c0, %c0_3] : memref<128x128xf32, #tpu.memory_space<vmem>>, vector<128x128xf32>
      tpu.vector_store %arg10[%c0, %c0_3], %14 {strides = array<i32>} : memref<128x128xf32, #tpu.memory_space<vmem>>, vector<128x128xf32>,
    } else {
    }
    %3 = arith.index_cast %arg0 : i32 to index
    %4 = memref.load %arg3[%3] : memref<1xi32, #tpu.memory_space<smem>>
    %5 = arith.cmpi slt, %arg1, %4 : i32
    %6 = arith.extui %5 : i1 to i32
    %c0_i32_1 = arith.constant 0 : i32
    %7 = arith.cmpi ne, %6, %c0_i32_1 : i32
    scf.if %7 {
      %c1_i32_3 = arith.constant 1 : i32
      %14 = arith.muli %arg0, %c1_i32_3 : i32
      %15 = arith.addi %14, %arg1 : i32
      %16 = arith.index_cast %15 : i32 to index
      %17 = memref.load %arg2[%16] : memref<1xi32, #tpu.memory_space<smem>>
      %c128_i32 = arith.constant 128 : i32
      %18 = arith.muli %17, %c128_i32 : i32
      %19 = tpu.assume_multiple %18, 128 : i32
      %20 = arith.index_cast %19 : i32 to index
      %c0 = arith.constant 0 : index
      %21 = vector.load %arg5[%20, %c0] : memref<128x128xbf16, #tpu.memory_space<vmem>>, vector<128x128xbf16>
      %c0_4 = arith.constant 0 : index
      %c0_5 = arith.constant 0 : index
      %22 = vector.load %arg4[%c0_4, %c0_5] : memref<128x128xi8, #tpu.memory_space<vmem>>, vector<128x128xi8>
      %23 = arith.sitofp %22 : vector<128x128xi8> to vector<128x128xf32>
      %24 = arith.truncf %23 : vector<128x128xf32> to vector<128x128xbf16>
      %c0_6 = arith.constant 0 : index
      %c0_7 = arith.constant 0 : index
      %25 = vector.load %arg10[%c0_6, %c0_7] : memref<128x128xf32, #tpu.memory_space<vmem>>, vector<128x128xf32>
      %cst = arith.constant dense<0.000000e+00> : vector<128x128xf32>
      %26 = tpu.matmul %24, %21, %cst {dimension_numbers = #tpu.dot_dimension_numbers<[1], [0], [0], [1], [0, 0, 1, 1], [], []>} : vector<128x128xbf16>, vector<128x128xbf16>, vector<128x128xf32> -> vector<128x128xf32>
      %27 = arith.addf %25, %26 : vector<128x128xf32>
      %c0_8 = arith.constant 0 : index
      %c0_9 = arith.constant 0 : index
      %28 = vector.load %arg10[%c0_8, %c0_9] : memref<128x128xf32, #tpu.memory_space<vmem>>, vector<128x128xf32>
      tpu.vector_store %arg10[%c0_8, %c0_9], %27 {strides = array<i32>} : memref<128x128xf32, #tpu.memory_space<vmem>>, vector<128x128xf32>,
    } else {
    }
    %8 = arith.index_cast %arg0 : i32 to index
    %9 = memref.load %arg3[%8] : memref<1xi32, #tpu.memory_space<smem>>
    %c1_i32 = arith.constant 1 : i32
    %10 = arith.subi %9, %c1_i32 : i32
    %11 = arith.cmpi eq, %arg1, %10 : i32
    %12 = arith.extui %11 : i1 to i32
    %c0_i32_2 = arith.constant 0 : i32
    %13 = arith.cmpi ne, %12, %c0_i32_2 : i32
    scf.if %13 {
      %c0 = arith.constant 0 : index
      %c0_3 = arith.constant 0 : index
      %14 = vector.load %arg10[%c0, %c0_3] : memref<128x128xf32, #tpu.memory_space<vmem>>, vector<128x128xf32>
      %c0_4 = arith.constant 0 : index
      %c0_5 = arith.constant 0 : index
      %15 = vector.load %arg6[%c0_4, %c0_5] : memref<128x1xf32, #tpu.memory_space<vmem>>, vector<128x1xf32>
      %16 = vector.broadcast %15 : vector<128x1xf32> to vector<128x128xf32>
      %17 = arith.mulf %14, %16 : vector<128x128xf32>
      %18 = arith.truncf %17 : vector<128x128xf32> to vector<128x128xbf16>
      %c0_6 = arith.constant 0 : index
      %c0_7 = arith.constant 0 : index
      %19 = vector.load %arg7[%c0_6, %c0_7] : memref<128x128xbf16, #tpu.memory_space<vmem>>, vector<128x128xbf16>
      %cst = arith.constant dense<0.000000e+00> : vector<128x128xf32>
      %20 = tpu.matmul %18, %19, %cst {dimension_numbers = #tpu.dot_dimension_numbers<[1], [0], [0], [1], [0, 0, 1, 1], [], []>} : vector<128x128xbf16>, vector<128x128xbf16>, vector<128x128xf32> -> vector<128x128xf32>
      %c0_8 = arith.constant 0 : index
      %c0_9 = arith.constant 0 : index
      %21 = vector.load %arg8[%c0_8, %c0_9] : memref<1x128xf32, #tpu.memory_space<vmem>>, vector<1x128xf32>
      %22 = vector.broadcast %21 : vector<1x128xf32> to vector<128x128xf32>
      %23 = arith.addf %20, %22 : vector<128x128xf32>
      %cst_10 = arith.constant 0.000000e+00 : f32
      %24 = vector.broadcast %cst_10 : f32 to vector<128x128xf32>
      %25 = arith.maximumf %23, %24 : vector<128x128xf32>
      %26 = arith.truncf %25 : vector<128x128xf32> to vector<128x128xbf16>
      %c0_11 = arith.constant 0 : index
      %c0_12 = arith.constant 0 : index
      %27 = vector.load %arg9[%c0_11, %c0_12] : memref<128x128xbf16, #tpu.memory_space<vmem>>, vector<128x128xbf16>
      tpu.vector_store %arg9[%c0_11, %c0_12], %26 {strides = array<i32>} : memref<128x128xbf16, #tpu.memory_space<vmem>>, vector<128x128xbf16>,
    } else {
    }
    return
  }
  func.func @transform_0(%arg0: i32, %arg1: i32, %arg2: memref<1xi32, #tpu.memory_space<smem>>, %arg3: memref<1xi32, #tpu.memory_space<smem>>) -> (i32, i32) {
    %c1_i32 = arith.constant 1 : i32
    %0 = arith.muli %arg0, %c1_i32 : i32
    %1 = arith.addi %0, %arg1 : i32
    %2 = arith.index_cast %1 : i32 to index
    %3 = memref.load %arg2[%2] : memref<1xi32, #tpu.memory_space<smem>>
    %c0_i32 = arith.constant 0 : i32
    return %arg0, %3 : i32, i32
  }
  func.func @transform_1(%arg0: i32, %arg1: i32, %arg2: memref<1xi32, #tpu.memory_space<smem>>, %arg3: memref<1xi32, #tpu.memory_space<smem>>) -> (i32, i32) {
    %c0_i32 = arith.constant 0 : i32
    %c0_i32_0 = arith.constant 0 : i32
    %c0_i32_1 = arith.constant 0 : i32
    return %c0_i32, %c0_i32_0 : i32, i32
  }
  func.func @transform_2(%arg0: i32, %arg1: i32, %arg2: memref<1xi32, #tpu.memory_space<smem>>, %arg3: memref<1xi32, #tpu.memory_space<smem>>) -> (i32, i32) {
    %c0_i32 = arith.constant 0 : i32
    %c0_i32_0 = arith.constant 0 : i32
    return %arg0, %c0_i32 : i32, i32
  }
  func.func @transform_3(%arg0: i32, %arg1: i32, %arg2: memref<1xi32, #tpu.memory_space<smem>>, %arg3: memref<1xi32, #tpu.memory_space<smem>>) -> (i32, i32) {
    %c0_i32 = arith.constant 0 : i32
    %c0_i32_0 = arith.constant 0 : i32
    %c0_i32_1 = arith.constant 0 : i32
    return %c0_i32, %c0_i32_0 : i32, i32
  }
  func.func @transform_4(%arg0: i32, %arg1: i32, %arg2: memref<1xi32, #tpu.memory_space<smem>>, %arg3: memref<1xi32, #tpu.memory_space<smem>>) -> (i32, i32) {
    %c0_i32 = arith.constant 0 : i32
    %c0_i32_0 = arith.constant 0 : i32
    %c0_i32_1 = arith.constant 0 : i32
    return %c0_i32, %c0_i32_0 : i32, i32
  }
  func.func @transform_5(%arg0: i32, %arg1: i32, %arg2: memref<1xi32, #tpu.memory_space<smem>>, %arg3: memref<1xi32, #tpu.memory_space<smem>>) -> (i32, i32) {
    %c0_i32 = arith.constant 0 : i32
    %c0_i32_0 = arith.constant 0 : i32
    return %arg0, %c0_i32 : i32, i32
  }
}

</mosaic_0001>

<bundles_post_ra>
// kernel: gnn_forward.2
= control target key start
LH: loop header
LB: loop body
LE: loop exit
PB: predicated region body
PF: predicated region fallthrough
CT: control target
= control target key end

     0   :  { %v791_v0 = vmov 0.0   ;;  %s969_s0 = inlined_call_operand.<no memory space> [shape: s32[1], index: 0, kind: input, shape index: {}]   ;;  %s970_s1 = inlined_call_operand.<no memory space> [shape: s32[1], index: 1, kind: input, shape index: {}]   ;;  %s971_s3 = inlined_call_operand.vmem [shape: bf16[128,128], index: 3, kind: input, shape index: {}]   ;;  %s972_s4 = inlined_call_operand.vmem [shape: f32[128,1], index: 4, kind: input, shape index: {}]   ;;  %s973_s5 = inlined_call_operand.vmem [shape: bf16[128,128], index: 5, kind: input, shape index: {}]   ;;  %s974_s6 = inlined_call_operand.vmem [shape: f32[1,128], index: 6, kind: input, shape index: {}]   ;;  %s975_s7 = inlined_call_operand.vmem [shape: bf16[128,128], index: 7, kind: output, shape index: {}]   ;;  %s976_s2 = inlined_call_operand.vmem [shape: s8[128,128], index: 2, kind: input, shape index: {}]  }
   0x1   :  { %12 = sst [smem:[#allocation4]] %s969_s0  ;;  %p40_p0 = scmp.lt.s32.totalorder %s969_s0, 0  ;;  %50 = vst [vmem:[#allocation2 + $0x30] sm:$0xff] %v791_v0 }
   0x2   :  { %13 = sst [smem:[#allocation5]] %s970_s1  ;;  %51 = vst [vmem:[#allocation2] sm:$0xff] %v791_v0  ;;  %p604_p1 = scmp.le.s32.totalorder %s970_s1, 0 }
   0x3   :  { %s978_s0 = smov (!%p40_p0, %s969_s0), 0  ;;  %52 = vst [vmem:[#allocation2 + $0x58] sm:$0xff] %v791_v0 }
   0x4   :  { %53 = vst [vmem:[#allocation2 + $0x18] sm:$0xff] %v791_v0  ;;  %s602_s9 = sshll.u32 %s978_s0, 3  ;;  %s72_s0 = sld [smem:[#allocation4]] (!%p604_p1) }
   0x5   :  { %54 = vst [vmem:[#allocation2 + $0x50] sm:$0xff] %v791_v0  ;;  %s848_s12 = scalar_lea.vmem %s976_s2, %s602_s9 }
   0x6   :  { %55 = vst [vmem:[#allocation2 + $0x68] sm:$0xff] %v791_v0 }
   0x7   :  { %56 = vst [vmem:[#allocation2 + $0x8] sm:$0xff] %v791_v0 }
   0x8   :  { %57 = vst [vmem:[#allocation2 + $0x48] sm:$0xff] %v791_v0 }
   0x9   :  { %58 = vst [vmem:[#allocation2 + $0x40] sm:$0xff] %v791_v0 }
   0xa   :  { %59 = vst [vmem:[#allocation2 + $0x20] sm:$0xff] %v791_v0  ;;  %s605_s15 = sshll.u32 (!%p604_p1), %s72_s0, 7 }
   0xb   :  { %60 = vst [vmem:[#allocation2 + $0x10] sm:$0xff] %v791_v0  ;;  %s74_s2 = sshra.s32 (!%p604_p1), %s605_s15, 3 }
   0xc   :  { %61 = vst [vmem:[#allocation2 + $0x38] sm:$0xff] %v791_v0  ;;  %70 = sbr.rel (%p604_p1) target bundleno = 210 (0xd2), region = 29  ;;  %s606_s16 = sshll.u32 (!%p604_p1), %s74_s2, 2 }
   0xd   :  { %62 = vst [vmem:[#allocation2 + $0x60] sm:$0xff] %v791_v0  ;;  %s856_s19 = scalar_lea.vmem (!%p604_p1), %s971_s3, %s606_s16 }
   0xe   :  { %63 = vst [vmem:[#allocation2 + $0x70] sm:$0xff] %v791_v0 }
   0xf   :  { %64 = vst [vmem:[#allocation2 + $0x78] sm:$0xff] %v791_v0 }
  0x10   :  { %65 = vst [vmem:[#allocation2 + $0x28] sm:$0xff] %v791_v0 }
  0x11   :  { %v681_v1 = vld [vmem:[%s856_s19 + $0x38] sm:$0xff]  ;;  %v680_v2 = vld [vmem:[%s856_s19 + $0x30] sm:$0xff]  ;;  %v679_v3 = vld [vmem:[%s856_s19 + $0x28] sm:$0xff] }
  0x12   :  { %202 = vmatpush.bf16.msra.mxu0 %v681_v1  ;;  %737 = vmatpush.bf16.msra.mxu1 %v681_v1  ;;  %v678_v4 = vld [vmem:[%s856_s19 + $0x20] sm:$0xff]  ;;  %v677_v5 = vld [vmem:[%s856_s19 + $0x18] sm:$0xff]  ;;  %v676_v6 = vld [vmem:[%s856_s19 + $0x10] sm:$0xff] }
  0x13   :  { %738 = vmatpush.bf16.msra.mxu2 %v681_v1  ;;  %739 = vmatpush.bf16.msra.mxu3 %v681_v1  ;;  %v94_v7 = vld [vmem:[%s848_s12] sm:$0xff]  ;;  %v95_v8 = vld [vmem:[%s848_s12 + $0x8] sm:$0xff]  ;;  %v96_v9 = vld [vmem:[%s848_s12 + $0x10] sm:$0xff] }
  0x14   :  { %v97_v10 = vld [vmem:[%s848_s12 + $0x18] sm:$0xff]  ;;  %v98_v11 = vunpack.c.0.s8 %v94_v7  ;;  %v99_v12 = vunpack.c.1.s8 %v94_v7  ;;  %v102_v13 = vunpack.c.0.s8 %v95_v8  ;;  %v103_v14 = vunpack.c.1.s8 %v95_v8  ;;  %v675_v15 = vld [vmem:[%s856_s19 + $0x8] sm:$0xff]  ;;  %v674_v24 = vld [vmem:[%s856_s19] sm:$0xff] }
  0x15   :  { %v106_v16 = vunpack.c.0.s8 %v96_v9  ;;  %v107_v17 = vunpack.c.1.s8 %v96_v9  ;;  %v110_v18 = vunpack.c.0.s8 %v97_v10  ;;  %v111_v19 = vunpack.c.1.s8 %v97_v10  ;;  %v138_v53 = vld [vmem:[#allocation2 + $0x30] sm:$0xff]  ;;  %v146_v59 = vld [vmem:[#allocation2 + $0x40] sm:$0xff]  ;;  %v143_v62 = vld [vmem:[#allocation2 + $0x68] sm:$0xff] }
  0x16   :  { %203 = vmatpush.bf16.msra.mxu0 %v680_v2  ;;  %740 = vmatpush.bf16.msra.mxu1 %v680_v2  ;;  %v114_v20 = vcvt.s32.f32 %v98_v11  ;;  %v115_v21 = vcvt.s32.f32 %v99_v12  ;;  %v118_v22 = vcvt.s32.f32 %v102_v13  ;;  %v119_v23 = vcvt.s32.f32 %v103_v14  ;;  %v142_v54 = vld [vmem:[#allocation2 + $0x50] sm:$0xff]  ;;  %v150_v60 = vld [vmem:[#allocation2 + $0x60] sm:$0xff] }
  0x17   :  { %741 = vmatpush.bf16.msra.mxu2 %v680_v2  ;;  %742 = vmatpush.bf16.msra.mxu3 %v680_v2  ;;  %v122_v25 = vcvt.s32.f32 %v106_v16  ;;  %v123_v26 = vcvt.s32.f32 %v107_v17  ;;  %v126_v27 = vcvt.s32.f32 %v110_v18  ;;  %v127_v28 = vcvt.s32.f32 %v111_v19  ;;  %v139_v61 = vld [vmem:[#allocation2] sm:$0xff]  ;;  %v148_v19 = vld [vmem:[#allocation2 + $0x10] sm:$0xff] }
  0x18   :  { %v130_v29 = vpack.c.bf16 %v115_v21, %v114_v20  ;;  %v132_v30 = vpack.c.bf16 %v119_v23, %v118_v22  ;;  %v100_v33 = vunpack.c.2.s8 %v94_v7  ;;  %v101_v34 = vunpack.c.3.s8 %v94_v7  ;;  %v147_v7 = vld [vmem:[#allocation2 + $0x20] sm:$0xff]  ;;  %v152_v20 = vld [vmem:[#allocation2 + $0x78] sm:$0xff]  ;;  %v145_v22 = vld [vmem:[#allocation2 + $0x48] sm:$0xff] }
  0x19   :  { %v134_v31 = vpack.c.bf16 %v123_v26, %v122_v25  ;;  %v136_v32 = vpack.c.bf16 %v127_v28, %v126_v27  ;;  %v104_v35 = vunpack.c.2.s8 %v95_v8  ;;  %v105_v36 = vunpack.c.3.s8 %v95_v8  ;;  %v151_v8 = vld [vmem:[#allocation2 + $0x70] sm:$0xff]  ;;  %v141_v21 = vld [vmem:[#allocation2 + $0x18] sm:$0xff] }
  0x1a   :  { %204 = vmatpush.bf16.msra.mxu0 %v679_v3  ;;  %743 = vmatpush.bf16.msra.mxu1 %v679_v3  ;;  %v108_v37 = vunpack.c.2.s8 %v96_v9  ;;  %v109_v38 = vunpack.c.3.s8 %v96_v9  ;;  %v112_v39 = vunpack.c.2.s8 %v97_v10  ;;  %v113_v40 = vunpack.c.3.s8 %v97_v10  ;;  %v140_v9 = vld [vmem:[#allocation2 + $0x58] sm:$0xff]  ;;  %v144_v10 = vld [vmem:[#allocation2 + $0x8] sm:$0xff] }
  0x1b   :  { %744 = vmatpush.bf16.msra.mxu2 %v679_v3  ;;  %745 = vmatpush.bf16.msra.mxu3 %v679_v3  ;;  %v116_v41 = vcvt.s32.f32 %v100_v33  ;;  %v117_v42 = vcvt.s32.f32 %v101_v34  ;;  %v120_v43 = vcvt.s32.f32 %v104_v35  ;;  %v121_v44 = vcvt.s32.f32 %v105_v36 }
  0x1c   :  { %v124_v45 = vcvt.s32.f32 %v108_v37  ;;  %v125_v46 = vcvt.s32.f32 %v109_v38  ;;  %v128_v47 = vcvt.s32.f32 %v112_v39  ;;  %v129_v48 = vcvt.s32.f32 %v113_v40 }
  0x1d   :  { %v131_v49 = vpack.c.bf16 %v117_v42, %v116_v41  ;;  %v133_v50 = vpack.c.bf16 %v121_v44, %v120_v43 }
  0x1e   :  { %205 = vmatpush.bf16.msra.mxu0 %v678_v4  ;;  %746 = vmatpush.bf16.msra.mxu1 %v678_v4  ;;  %v135_v51 = vpack.c.bf16 %v125_v46, %v124_v45  ;;  %v137_v52 = vpack.c.bf16 %v129_v48, %v128_v47 }
  0x1f   :  { %747 = vmatpush.bf16.msra.mxu2 %v678_v4  ;;  %748 = vmatpush.bf16.msra.mxu3 %v678_v4 }
  0x22   :  { %206 = vmatpush.bf16.msra.mxu0 %v677_v5  ;;  %749 = vmatpush.bf16.msra.mxu1 %v677_v5 }
  0x23   :  { %750 = vmatpush.bf16.msra.mxu2 %v677_v5  ;;  %751 = vmatpush.bf16.msra.mxu3 %v677_v5 }
  0x26   :  { %207 = vmatpush.bf16.msra.mxu0 %v676_v6  ;;  %752 = vmatpush.bf16.msra.mxu1 %v676_v6 }
  0x27   :  { %753 = vmatpush.bf16.msra.mxu2 %v676_v6  ;;  %754 = vmatpush.bf16.msra.mxu3 %v676_v6 }
  0x2a   :  { %208 = vmatpush.bf16.msra.mxu0 %v675_v15  ;;  %755 = vmatpush.bf16.msra.mxu1 %v675_v15 }
  0x2b   :  { %756 = vmatpush.bf16.msra.mxu2 %v675_v15  ;;  %757 = vmatpush.bf16.msra.mxu3 %v675_v15 }
  0x2e   :  { %209 = vmatpush.bf16.msra.mxu0 %v674_v24  ;;  %758 = vmatpush.bf16.msra.mxu1 %v674_v24 }
  0x2f   :  { %759 = vmatpush.bf16.msra.mxu2 %v674_v24  ;;  %760 = vmatpush.bf16.msra.mxu3 %v674_v24 }
  0x31   :  { %210 = vmatmul.bf16.vlgmr.msra.gmra.mxu0 %v130_v29  ;;  %220 = vmatmul.bf16.vlgmr.msra.gmra.mxu1 %v132_v30 }
  0x32   :  { %230 = vmatmul.bf16.vlgmr.msra.gmra.mxu2 %v134_v31  ;;  %240 = vmatmul.bf16.vlgmr.msra.gmra.mxu3 %v136_v32  ;;  %v149_v31 = vld [vmem:[#allocation2 + $0x38] sm:$0xff]  ;;  %v153_v32 = vld [vmem:[#allocation2 + $0x28] sm:$0xff] }
  0x41   :  { %215 = vmatmul.bf16.gmra.mxu0 %v131_v49  ;;  %225 = vmatmul.bf16.gmra.mxu1 %v133_v50 }
  0x42   :  { %235 = vmatmul.bf16.gmra.mxu2 %v135_v51  ;;  %245 = vmatmul.bf16.gmra.mxu3 %v137_v52 }
  0xae   :  { %v211_v55 = vpop.f32.mrf.mxu0  ;;  %v221_v56 = vpop.f32.mrf.mxu1 }
  0xaf   :  { %v251_v57 = vadd.f32 %v211_v55, %v138_v53  ;;  %v255_v58 = vadd.f32 %v221_v56, %v142_v54 }
  0xb1   :  { %267 = vst [vmem:[#allocation2 + $0x30] sm:$0xff] %v251_v57 }
  0xb2   :  { %271 = vst [vmem:[#allocation2 + $0x50] sm:$0xff] %v255_v58 }
  0xb5   :  { %v231_v63 = vpop.f32.mrf.mxu2  ;;  %v241_v0 = vpop.f32.mrf.mxu3 }
  0xb6   :  { %v259_v1 = vadd.f32 %v231_v63, %v146_v59  ;;  %v263_v2 = vadd.f32 %v241_v0, %v150_v60  ;;  %v213_v3 = vpop.f32.mrf.mxu0  ;;  %v223_v4 = vpop.f32.mrf.mxu1 }
  0xb7   :  { %v252_v5 = vadd.f32 %v213_v3, %v139_v61  ;;  %v256_v6 = vadd.f32 %v223_v4, %v143_v62 }
  0xb8   :  { %275 = vst [vmem:[#allocation2 + $0x40] sm:$0xff] %v259_v1 }
  0xb9   :  { %279 = vst [vmem:[#allocation2 + $0x60] sm:$0xff] %v263_v2 }
  0xba   :  { %268 = vst [vmem:[#allocation2] sm:$0xff] %v252_v5 }
  0xbb   :  { %272 = vst [vmem:[#allocation2 + $0x68] sm:$0xff] %v256_v6 }
  0xbd   :  { %v233_v11 = vpop.f32.mrf.mxu2  ;;  %v243_v12 = vpop.f32.mrf.mxu3 }
  0xbe   :  { %v260_v13 = vadd.f32 %v233_v11, %v147_v7  ;;  %v264_v14 = vadd.f32 %v243_v12, %v151_v8  ;;  %v216_v15 = vpop.f32.mrf.mxu0  ;;  %v226_v16 = vpop.f32.mrf.mxu1 }
  0xbf   :  { %v253_v17 = vadd.f32 %v216_v15, %v140_v9  ;;  %v257_v18 = vadd.f32 %v226_v16, %v144_v10 }
  0xc0   :  { %276 = vst [vmem:[#allocation2 + $0x20] sm:$0xff] %v260_v13 }
  0xc1   :  { %280 = vst [vmem:[#allocation2 + $0x70] sm:$0xff] %v264_v14 }
  0xc2   :  { %269 = vst [vmem:[#allocation2 + $0x58] sm:$0xff] %v253_v17 }
  0xc3   :  { %273 = vst [vmem:[#allocation2 + $0x8] sm:$0xff] %v257_v18 }
  0xc5   :  { %v236_v23 = vpop.f32.mrf.mxu2  ;;  %v246_v24 = vpop.f32.mrf.mxu3 }
  0xc6   :  { %v261_v25 = vadd.f32 %v236_v23, %v148_v19  ;;  %v265_v26 = vadd.f32 %v246_v24, %v152_v20  ;;  %v218_v27 = vpop.f32.mrf.mxu0  ;;  %v228_v28 = vpop.f32.mrf.mxu1 }
  0xc7   :  { %v254_v29 = vadd.f32 %v218_v27, %v141_v21  ;;  %v258_v30 = vadd.f32 %v228_v28, %v145_v22 }
  0xc8   :  { %277 = vst [vmem:[#allocation2 + $0x10] sm:$0xff] %v261_v25 }
  0xc9   :  { %281 = vst [vmem:[#allocation2 + $0x78] sm:$0xff] %v265_v26 }
  0xca   :  { %270 = vst [vmem:[#allocation2 + $0x18] sm:$0xff] %v254_v29 }
  0xcb   :  { %274 = vst [vmem:[#allocation2 + $0x48] sm:$0xff] %v258_v30 }
  0xcd   :  { %v238_v33 = vpop.f32.mrf.mxu2  ;;  %v248_v34 = vpop.f32.mrf.mxu3 }
  0xce   :  { %v262_v35 = vadd.f32 %v238_v33, %v149_v31  ;;  %v266_v36 = vadd.f32 %v248_v34, %v153_v32 }
  0xd0   :  { %278 = vst [vmem:[#allocation2 + $0x38] sm:$0xff] %v262_v35 }
  0xd1   :  { %282 = vst [vmem:[#allocation2 + $0x28] sm:$0xff] %v266_v36 }
  0xd2 PF:  { %s283_s1 = sld [smem:[#allocation5]] }
  0xd8   :  { %s639_s3 = sadd.s32 4294967295, %s283_s1 }
  0xd9   :  { %p641_p2 = scmp.ne.s32.totalorder %s639_s3, 0 }
  0xdb   :  { %288 = sbr.rel (%p641_p2) target bundleno = 527 (0x20f), region = 33 }
  0xe0   :  { %v317_v37 = vld [vmem:[%s972_s4 + $0x60] sm:$0xff]  ;;  %v792_v40 = vmov 0   ;;  %v318_v41 = vld [vmem:[%s972_s4 + $0x68] sm:$0xff]  ;;  %v689_v44 = vld [vmem:[%s973_s5 + $0x38] sm:$0xff] }
  0xe1   :  { %v313_v38 = vld [vmem:[%s972_s4 + $0x40] sm:$0xff]  ;;  %789 = vset.pattern.permute.xlu2 %v792_v40  ;;  %788 = vset.pattern.permute.xlu1 %v792_v40  ;;  %v314_v42 = vld [vmem:[%s972_s4 + $0x48] sm:$0xff]  ;;  %v315_v47 = vld [vmem:[%s972_s4 + $0x50] sm:$0xff] }
  0xe2   :  { %v305_v39 = vld [vmem:[%s972_s4] sm:$0xff]  ;;  %787 = vset.pattern.permute.xlu0 %v792_v40  ;;  %383 = vperm.xlu1 %788, %v317_v37   ;;  %v306_v43 = vld [vmem:[%s972_s4 + $0x8] sm:$0xff]  ;;  %v319_v48 = vld [vmem:[%s972_s4 + $0x70] sm:$0xff] }
  0xe3   :  { %363 = vperm.xlu0 %787, %v313_v38   ;;  %323 = vperm.xlu2 %789, %v305_v39   ;;  %v310_v45 = vld [vmem:[%s972_s4 + $0x28] sm:$0xff]  ;;  %v309_v46 = vld [vmem:[%s972_s4 + $0x20] sm:$0xff]  ;;  %v316_v49 = vld [vmem:[%s972_s4 + $0x58] sm:$0xff] }
  0xe4   :  { %493 = vmatpush.bf16.msra.mxu0 %v689_v44  ;;  %762 = vmatpush.bf16.msra.mxu2 %v689_v44  ;;  %v320_v50 = vld [vmem:[%s972_s4 + $0x78] sm:$0xff]  ;;  %v307_v52 = vld [vmem:[%s972_s4 + $0x10] sm:$0xff]  ;;  %v687_v56 = vld [vmem:[%s973_s5 + $0x28] sm:$0xff] }
  0xe5   :  { %763 = vmatpush.bf16.msra.mxu3 %v689_v44  ;;  %761 = vmatpush.bf16.msra.mxu1 %v689_v44  ;;  %v308_v51 = vld [vmem:[%s972_s4 + $0x18] sm:$0xff]  ;;  %v311_v53 = vld [vmem:[%s972_s4 + $0x30] sm:$0xff]  ;;  %v686_v57 = vld [vmem:[%s973_s5 + $0x20] sm:$0xff] }
  0xe6   :  { %v312_v54 = vld [vmem:[%s972_s4 + $0x38] sm:$0xff]  ;;  %v688_v55 = vld [vmem:[%s973_s5 + $0x30] sm:$0xff]  ;;  %v683_v60 = vld [vmem:[%s973_s5 + $0x8] sm:$0xff] }
  0xe7   :  { %v685_v58 = vld [vmem:[%s973_s5 + $0x18] sm:$0xff]  ;;  %v684_v59 = vld [vmem:[%s973_s5 + $0x10] sm:$0xff]  ;;  %v682_v61 = vld [vmem:[%s973_s5] sm:$0xff] }
  0xe8   :  { %494 = vmatpush.bf16.msra.mxu0 %v688_v55  ;;  %765 = vmatpush.bf16.msra.mxu2 %v688_v55  ;;  %v289_v63 = vld [vmem:[#allocation2 + $0x30] sm:$0xff]  ;;  %v290_v0 = vld [vmem:[#allocation2] sm:$0xff]  ;;  %v294_v20 = vld [vmem:[#allocation2 + $0x68] sm:$0xff] }
  0xe9   :  { %766 = vmatpush.bf16.msra.mxu3 %v688_v55  ;;  %764 = vmatpush.bf16.msra.mxu1 %v688_v55  ;;  %v301_v7 = vld [vmem:[#allocation2 + $0x60] sm:$0xff]  ;;  %v302_v8 = vld [vmem:[#allocation2 + $0x70] sm:$0xff]  ;;  %v304_v27 = vld [vmem:[#allocation2 + $0x28] sm:$0xff] }
  0xea   :  { %388 = vperm.xlu1 %788, %v318_v41   ;;  %v297_v10 = vld [vmem:[#allocation2 + $0x40] sm:$0xff]  ;;  %v293_v21 = vld [vmem:[#allocation2 + $0x50] sm:$0xff]  ;;  %v303_v28 = vld [vmem:[#allocation2 + $0x78] sm:$0xff] }
  0xeb   :  { %368 = vperm.xlu0 %787, %v314_v42   ;;  %328 = vperm.xlu2 %789, %v306_v43   ;;  %v298_v11 = vld [vmem:[#allocation2 + $0x20] sm:$0xff]  ;;  %v299_v29 = vld [vmem:[#allocation2 + $0x10] sm:$0xff]  ;;  %v300_v30 = vld [vmem:[#allocation2 + $0x38] sm:$0xff] }
  0xec   :  { %495 = vmatpush.bf16.msra.mxu0 %v687_v56  ;;  %768 = vmatpush.bf16.msra.mxu2 %v687_v56  ;;  %v292_v40 = vld [vmem:[#allocation2 + $0x18] sm:$0xff]  ;;  %v790_v55 = vld [vmem:[%s974_s6] ss:$0 sm:$0xff] }
  0xed   :  { %769 = vmatpush.bf16.msra.mxu3 %v687_v56  ;;  %767 = vmatpush.bf16.msra.mxu1 %v687_v56  ;;  %v291_v41 = vld [vmem:[#allocation2 + $0x58] sm:$0xff] }
  0xf0   :  { %496 = vmatpush.bf16.msra.mxu0 %v686_v57  ;;  %771 = vmatpush.bf16.msra.mxu2 %v686_v57 }
  0xf1   :  { %772 = vmatpush.bf16.msra.mxu3 %v686_v57  ;;  %770 = vmatpush.bf16.msra.mxu1 %v686_v57 }
  0xf2   :  { %348 = vperm.xlu1 %788, %v310_v45  }
  0xf3   :  { %343 = vperm.xlu0 %787, %v309_v46   ;;  %373 = vperm.xlu2 %789, %v315_v47  }
  0xf4   :  { %497 = vmatpush.bf16.msra.mxu0 %v685_v58  ;;  %774 = vmatpush.bf16.msra.mxu2 %v685_v58 }
  0xf5   :  { %775 = vmatpush.bf16.msra.mxu3 %v685_v58  ;;  %773 = vmatpush.bf16.msra.mxu1 %v685_v58 }
  0xf8   :  { %498 = vmatpush.bf16.msra.mxu0 %v684_v59  ;;  %777 = vmatpush.bf16.msra.mxu2 %v684_v59 }
  0xf9   :  { %778 = vmatpush.bf16.msra.mxu3 %v684_v59  ;;  %776 = vmatpush.bf16.msra.mxu1 %v684_v59 }
  0xfa   :  { %393 = vperm.xlu1 %788, %v319_v48   ;;  %v295_v48 = vld [vmem:[#allocation2 + $0x8] sm:$0xff] }
  0xfb   :  { %378 = vperm.xlu0 %787, %v316_v49   ;;  %398 = vperm.xlu2 %789, %v320_v50   ;;  %v296_v49 = vld [vmem:[#allocation2 + $0x48] sm:$0xff] }
  0xfc   :  { %499 = vmatpush.bf16.msra.mxu0 %v683_v60  ;;  %780 = vmatpush.bf16.msra.mxu2 %v683_v60 }
  0xfd   :  { %781 = vmatpush.bf16.msra.mxu3 %v683_v60  ;;  %779 = vmatpush.bf16.msra.mxu1 %v683_v60 }
 0x100   :  { %500 = vmatpush.bf16.msra.mxu0 %v682_v61  ;;  %783 = vmatpush.bf16.msra.mxu2 %v682_v61 }
 0x101   :  { %784 = vmatpush.bf16.msra.mxu3 %v682_v61  ;;  %782 = vmatpush.bf16.msra.mxu1 %v682_v61 }
 0x102   :  { %338 = vperm.xlu1 %788, %v308_v51  }
 0x103   :  { %333 = vperm.xlu0 %787, %v307_v52   ;;  %353 = vperm.xlu2 %789, %v311_v53  }
 0x10b   :  { %358 = vperm.xlu0 %787, %v312_v54  }
 0x13d   :  { %v324_v62 = vpop.permute.xlu2 %323 }
 0x13e   :  { %v401_v1 = vmul.f32 %v324_v62, %v289_v63 }
 0x145   :  { %v329_v2 = vpop.permute.xlu2 %328 }
 0x146   :  { %v402_v3 = vmul.f32 %v329_v2, %v290_v0 }
 0x148   :  { %v417_v4 = vpack.c.bf16 %v402_v3, %v401_v1 }
 0x14a   :  { %501 = vmatmul.bf16.vlgmr.msra.gmra.mxu0 %v417_v4 }
 0x14d   :  { %v374_v19 = vpop.permute.xlu2 %373 }
 0x14e   :  { %v411_v36 = vmul.f32 %v374_v19, %v299_v29 }
 0x154   :  { %v384_v5 = vpop.permute.xlu1 %383 }
 0x155   :  { %v364_v6 = vpop.permute.xlu0 %363  ;;  %v413_v9 = vmul.f32 %v384_v5, %v301_v7  ;;  %v399_v31 = vpop.permute.xlu2 %398 }
 0x156   :  { %v409_v15 = vmul.f32 %v364_v6, %v297_v10  ;;  %v416_v33 = vmul.f32 %v399_v31, %v304_v27 }
 0x15c   :  { %v389_v12 = vpop.permute.xlu1 %388 }
 0x15d   :  { %v414_v13 = vmul.f32 %v389_v12, %v302_v8  ;;  %v369_v14 = vpop.permute.xlu0 %368  ;;  %v354_v47 = vpop.permute.xlu2 %353 }
 0x15e   :  { %v410_v16 = vmul.f32 %v369_v14, %v298_v11  ;;  %v407_v51 = vmul.f32 %v354_v47, %v295_v48 }
 0x15f   :  { %v423_v17 = vpack.c.bf16 %v414_v13, %v413_v9 }
 0x160   :  { %v421_v18 = vpack.c.bf16 %v410_v16, %v409_v15 }
 0x161   :  { %531 = vmatmul.bf16.vlgmr.msra.gmra.mxu3 %v423_v17 }
 0x162   :  { %521 = vmatmul.bf16.vlgmr.msra.gmra.mxu2 %v421_v18 }
 0x164   :  { %v349_v22 = vpop.permute.xlu1 %348 }
 0x165   :  { %v406_v23 = vmul.f32 %v349_v22, %v294_v20  ;;  %v344_v24 = vpop.permute.xlu0 %343 }
 0x166   :  { %v405_v25 = vmul.f32 %v344_v24, %v293_v21 }
 0x168   :  { %v419_v26 = vpack.c.bf16 %v406_v23, %v405_v25 }
 0x16a   :  { %511 = vmatmul.bf16.vlgmr.msra.gmra.mxu1 %v419_v26 }
 0x16c   :  { %v394_v32 = vpop.permute.xlu1 %393 }
 0x16d   :  { %v415_v34 = vmul.f32 %v394_v32, %v303_v28  ;;  %v379_v35 = vpop.permute.xlu0 %378 }
 0x16e   :  { %v412_v37 = vmul.f32 %v379_v35, %v300_v30 }
 0x16f   :  { %v424_v38 = vpack.c.bf16 %v416_v33, %v415_v34 }
 0x170   :  { %v422_v39 = vpack.c.bf16 %v412_v37, %v411_v36 }
 0x171   :  { %536 = vmatmul.bf16.gmra.mxu3 %v424_v38 }
 0x172   :  { %526 = vmatmul.bf16.gmra.mxu2 %v422_v39 }
 0x174   :  { %v339_v42 = vpop.permute.xlu1 %338 }
 0x175   :  { %v404_v43 = vmul.f32 %v339_v42, %v292_v40  ;;  %v334_v44 = vpop.permute.xlu0 %333 }
 0x176   :  { %v403_v45 = vmul.f32 %v334_v44, %v291_v41 }
 0x178   :  { %v418_v46 = vpack.c.bf16 %v404_v43, %v403_v45 }
 0x17a   :  { %506 = vmatmul.bf16.gmra.mxu0 %v418_v46 }
 0x17d   :  { %v359_v50 = vpop.permute.xlu0 %358 }
 0x17e   :  { %v408_v52 = vmul.f32 %v359_v50, %v296_v49 }
 0x180   :  { %v420_v53 = vpack.c.bf16 %v408_v52, %v407_v51 }
 0x182   :  { %516 = vmatmul.bf16.gmra.mxu1 %v420_v53 }
 0x1c7   :  { %v502_v54 = vpop.f32.mrf.mxu0 }
 0x1c8   :  { %v503_v56 = vadd.f32 %v790_v55, %v502_v54 }
 0x1ca   :  { %v542_v58 = vmax.f32 %v503_v56, 0.0 }
 0x1cf   :  { %v504_v57 = vpop.f32.mrf.mxu0 }
 0x1d0   :  { %v505_v59 = vadd.f32 %v790_v55, %v504_v57 }
 0x1d2   :  { %v543_v60 = vmax.f32 %v505_v59, 0.0 }
 0x1d4   :  { %v693_v61 = vpack.c.bf16 %v543_v60, %v542_v58 }
 0x1d6   :  { %694 = vst [vmem:[%s975_s7] sm:$0xff] %v693_v61  }
 0x1e4   :  { %v532_v62 = vpop.f32.mrf.mxu3 }
 0x1e5   :  { %v522_v63 = vpop.f32.mrf.mxu2  ;;  %v533_v1 = vadd.f32 %v790_v55, %v532_v62 }
 0x1e6   :  { %v523_v2 = vadd.f32 %v790_v55, %v522_v63 }
 0x1e7   :  { %v512_v0 = vpop.f32.mrf.mxu1  ;;  %v554_v8 = vmax.f32 %v533_v1, 0.0 }
 0x1e8   :  { %v513_v6 = vadd.f32 %v790_v55, %v512_v0  ;;  %v550_v11 = vmax.f32 %v523_v2, 0.0 }
 0x1ea   :  { %v546_v15 = vmax.f32 %v513_v6, 0.0 }
 0x1ec   :  { %v534_v3 = vpop.f32.mrf.mxu3 }
 0x1ed   :  { %v524_v4 = vpop.f32.mrf.mxu2  ;;  %v535_v5 = vadd.f32 %v790_v55, %v534_v3 }
 0x1ee   :  { %v525_v7 = vadd.f32 %v790_v55, %v524_v4 }
 0x1ef   :  { %v555_v9 = vmax.f32 %v535_v5, 0.0  ;;  %v514_v10 = vpop.f32.mrf.mxu1 }
 0x1f0   :  { %v551_v12 = vmax.f32 %v525_v7, 0.0  ;;  %v515_v13 = vadd.f32 %v790_v55, %v514_v10 }
 0x1f1   :  { %v723_v14 = vpack.c.bf16 %v555_v9, %v554_v8 }
 0x1f2   :  { %v713_v16 = vpack.c.bf16 %v551_v12, %v550_v11  ;;  %v547_v17 = vmax.f32 %v515_v13, 0.0 }
 0x1f3   :  { %735 = vst [vmem:[%s975_s7 + $0x30] sm:$0xff] %v723_v14  }
 0x1f4   :  { %733 = vst [vmem:[%s975_s7 + $0x20] sm:$0xff] %v713_v16   ;;  %v703_v18 = vpack.c.bf16 %v547_v17, %v546_v15  ;;  %v537_v19 = vpop.f32.mrf.mxu3 }
 0x1f5   :  { %v527_v20 = vpop.f32.mrf.mxu2  ;;  %v538_v22 = vadd.f32 %v790_v55, %v537_v19 }
 0x1f6   :  { %731 = vst [vmem:[%s975_s7 + $0x10] sm:$0xff] %v703_v18   ;;  %v528_v23 = vadd.f32 %v790_v55, %v527_v20 }
 0x1f7   :  { %v507_v21 = vpop.f32.mrf.mxu0  ;;  %v556_v29 = vmax.f32 %v538_v22, 0.0 }
 0x1f8   :  { %v508_v27 = vadd.f32 %v790_v55, %v507_v21  ;;  %v552_v33 = vmax.f32 %v528_v23, 0.0 }
 0x1fa   :  { %v544_v37 = vmax.f32 %v508_v27, 0.0 }
 0x1fc   :  { %v539_v24 = vpop.f32.mrf.mxu3 }
 0x1fd   :  { %v529_v25 = vpop.f32.mrf.mxu2  ;;  %v540_v26 = vadd.f32 %v790_v55, %v539_v24 }
 0x1fe   :  { %v530_v28 = vadd.f32 %v790_v55, %v529_v25 }
 0x1ff   :  { %v557_v30 = vmax.f32 %v540_v26, 0.0  ;;  %v509_v31 = vpop.f32.mrf.mxu0  ;;  %v517_v32 = vpop.f32.mrf.mxu1 }
 0x200   :  { %v553_v34 = vmax.f32 %v530_v28, 0.0  ;;  %v510_v35 = vadd.f32 %v790_v55, %v509_v31  ;;  %v518_v41 = vadd.f32 %v790_v55, %v517_v32 }
 0x201   :  { %v728_v36 = vpack.c.bf16 %v557_v30, %v556_v29 }
 0x202   :  { %v718_v38 = vpack.c.bf16 %v553_v34, %v552_v33  ;;  %v545_v39 = vmax.f32 %v510_v35, 0.0  ;;  %v548_v44 = vmax.f32 %v518_v41, 0.0 }
 0x203   :  { %736 = vst [vmem:[%s975_s7 + $0x38] sm:$0xff] %v728_v36  }
 0x204   :  { %734 = vst [vmem:[%s975_s7 + $0x28] sm:$0xff] %v718_v38   ;;  %v698_v40 = vpack.c.bf16 %v545_v39, %v544_v37 }
 0x206   :  { %730 = vst [vmem:[%s975_s7 + $0x8] sm:$0xff] %v698_v40  }
 0x207   :  { %v519_v42 = vpop.f32.mrf.mxu1 }
 0x208   :  { %v520_v43 = vadd.f32 %v790_v55, %v519_v42 }
 0x20a   :  { %v549_v45 = vmax.f32 %v520_v43, 0.0 }
 0x20c   :  { %v708_v46 = vpack.c.bf16 %v549_v45, %v548_v44 }
 0x20e   :  { %732 = vst [vmem:[%s975_s7 + $0x18] sm:$0xff] %v708_v46  }
 0x20f PF:  {}

</bundles_post_ra>
